<compile_context>
chip_gen: v7x
topology: tpu7x:2x2x1
jax: 0.10.0
libtpu: 0.0.40
codegen_flags: <defaults>
</compile_context>

<pallas_src>
import numpy as np
import jax
import jax.numpy as jnp
from jax.experimental import pallas as pl
from jax.experimental.pallas import tpu as pltpu

# ---------------- DMPNet.__init__ defaults ----------------
N = 5                         # RBF basis functions
T = 10
L = 10                        # self.l
TAU = 1.0
A_Z = 15.0
B_Z = A_Z / 4.0
A_X = 1.0
DOF = 7                       # len(state_index)
DOF_PAD = 8                   # lane stride per time sample (7 -> 8)
DT = TAU / (T * L)            # 0.01
TS = int(round(TAU / DT)) + 1 # 101 time samples
STEPS = TS - 1                # 100 Euler steps == T * L
OUT_DIM = N * DOF + DOF       # 42  (fc_last output)
OUTP = 128                    # fc_last output padded to one full lane group
HIDDEN = 256                  # fc_last input size (num_layers == 1 branch)
SCALE = 1.0
DY0 = 0.05                    # dy0 = ones_like(y0) * 0.05
LANES = 128                   # output lane width; (T+1)*DOF_PAD = 88 <= 128


# ---------------- constant precompute (numpy, float64) ----------------
def _dmp_basis():
    """RBF forcing columns (DMPParameters): col[t] = psi(x_t) * x_t / sum(psi)."""
    c = np.exp(-A_X * np.linspace(0.0, 1.0, N))
    h = np.ones(N) * (N ** 1.5) / c / A_X
    cols = np.zeros((STEPS, N), dtype=np.float64)
    x = 1.0
    for t in range(STEPS):
        x = x + (-A_X * x) * TAU * DT          # phase updates before psi each step
        psi = np.exp(-h * (x - c) ** 2)
        cols[t] = psi * x / psi.sum()
    return cols


def _propagator_consts():
    """Closed-form propagator of the explicit-Euler DMP recurrence (LTI system).

    State s=[y;z]:  s_{i+1} = A s_i + g*goal + c*f_i,  sampled at m = k*L:
      y_m = cY[k]*y0 + cZ[k]*z0 + cG[k]*goal + sum_i W[k,i]*f_i
    """
    A = np.array([[1.0, TAU * DT],
                  [-A_Z * B_Z * TAU * DT, 1.0 - A_Z * TAU * DT]], dtype=np.float64)
    powers = [np.eye(2)]
    for _ in range(STEPS):
        powers.append(A @ powers[-1])
    alpha = A_Z * B_Z * TAU * DT
    cY = np.zeros(T + 1); cZ = np.zeros(T + 1); cG = np.zeros(T + 1)
    W = np.zeros((T + 1, STEPS))
    for k in range(T + 1):
        m = k * L
        cY[k] = powers[m][0, 0]
        cZ[k] = powers[m][0, 1]
        cG[k] = alpha * sum(powers[p][0, 1] for p in range(m))
        for i in range(m):
            W[k, i] = TAU * DT * powers[m - 1 - i][0, 1]
    return cY, cZ, cG, W


def _const_matrices(basis):
    """Bake the propagator into lane-dense constant operands.

    Output lane index j = k*8 + d (k = time sample, d = DOF), padded to 128 lanes.
      GQC (128, 384) = [ Eg | Q | Eg*cG ] acting on the padded head output (B,128):
          out @ Eg  -> goal broadcast over samples,  out @ Q -> P[k].w[b,d,:],
          out @ Eg*cG -> cG[k]*goal.
      YM  (8, 256)  = [ E8 | E8*cY ] acting on y0 (B,8).
      CZ  (1, 128)  = cZ[k]*z0  (z0 = dy0*tau is a constant scalar).
    """
    cY, cZc, cG, W = _propagator_consts()
    P = W @ basis                                    # (T+1, N)
    Eg = np.zeros((OUTP, LANES)); Q = np.zeros((OUTP, LANES)); EgG = np.zeros((OUTP, LANES))
    E8 = np.zeros((DOF_PAD, LANES)); E8Y = np.zeros((DOF_PAD, LANES))
    CZ = np.zeros((1, LANES))
    for k in range(T + 1):
        for d in range(DOF):
            j = k * DOF_PAD + d
            Eg[d, j] = 1.0
            EgG[d, j] = cG[k]
            E8[d, j] = 1.0
            E8Y[d, j] = cY[k]
            CZ[0, j] = cZc[k] * DY0 * TAU
            for n in range(N):
                Q[DOF + d * N + n, j] = P[k, n]
    GQC = np.concatenate([Eg, Q, EgG], axis=1).astype(np.float32)   # (128, 384)
    YM = np.concatenate([E8, E8Y], axis=1).astype(np.float32)       # (8, 256)
    return GQC, YM, CZ.astype(np.float32)


# ---------------- fused kernel: policy head + DMP propagator ----------------
def _fused_kernel(x_ref, w0_ref, b0_ref, w1_ref, b1_ref, gqc_ref, ym_ref, cz_ref,
                  y0_ref, y_ref, acc_ref):
    k = pl.program_id(1)

    @pl.when(k == 0)
    def _():
        # fold the first-layer bias into the accumulator init
        acc_ref[...] = jnp.broadcast_to(b0_ref[...], acc_ref.shape)

    # dominant matmul: Din-tiled, bf16 x bf16 on the MXU, f32 accumulation
    acc_ref[...] += jnp.dot(x_ref[...], w0_ref[...],
                            preferred_element_type=jnp.float32)

    @pl.when(k == pl.num_programs(1) - 1)
    def _():
        h = jnp.tanh(acc_ref[...]).astype(jnp.bfloat16)                  # (BT, 256)
        out = jnp.dot(h, w1_ref[...],
                      preferred_element_type=jnp.float32) + b1_ref[...]  # (BT, 128)
        if SCALE != 1.0:                      # elided at trace time when SCALE == 1.0
            out = out * SCALE

        # DMP integration as one small contraction against constant matrices.
        r = jnp.dot(out, gqc_ref[...], preferred_element_type=jnp.float32)   # (BT,384)
        ry = jnp.dot(y0_ref[...], ym_ref[...], preferred_element_type=jnp.float32)  # (BT,256)
        goal_e = r[:, 0:LANES]                # goal[b,d] broadcast to lane k*8+d
        f_e = r[:, LANES:2 * LANES]           # P[k] . w[b,d,:]
        cg_goal = r[:, 2 * LANES:3 * LANES]   # cG[k]*goal[b,d]
        y0_e = ry[:, 0:LANES]                 # y0[b,d]
        cy_y0 = ry[:, LANES:2 * LANES]        # cY[k]*y0[b,d]
        # Y[b, k*8+d] = cY*y0 + cG*goal + cZ*z0 + (goal - y0) * (P[k].w)
        y_ref[...] = cy_y0 + cg_goal + cz_ref[...] + (goal_e - y0_e) * f_e


def dmp_net_fused(x, w0, b0, w1, b1, gqc, ym, cz, y0p, *, bt, tk):
    """x:(Bp,Dp) bf16, w0:(Dp,256) bf16, b0:(1,256), w1:(256,128) bf16, b1:(1,128),
    gqc:(128,384), ym:(8,256), cz:(1,128), y0p:(Bp,8).  Returns (Bp,128) f32."""
    Bp, Dp = x.shape
    nb, nk = Bp // bt, Dp // tk

    flops = (2 * Bp * Dp * HIDDEN + 2 * Bp * HIDDEN * OUTP
             + 2 * Bp * OUTP * 3 * LANES + 2 * Bp * DOF_PAD * 2 * LANES
             + 6 * Bp * LANES)
    bytes_accessed = (x.size * 2 + w0.size * 2 + w1.size * 2
                      + (b0.size + b1.size + gqc.size + ym.size + cz.size
                         + y0p.size + Bp * LANES) * 4)
    # live set: double-buffered x/w0 tiles + resident small operands + scratch + out
    vmem_est = (2 * (bt * tk * 2 + tk * HIDDEN * 2)
                + HIDDEN * 4 + HIDDEN * OUTP * 2 + OUTP * 4
                + (gqc.size + ym.size + cz.size) * 4
                + 2 * (bt * DOF_PAD * 4 + bt * LANES * 4)
                + bt * HIDDEN * 4)
    vmem_limit = int(min(max(2 * vmem_est, 16 << 20), 64 << 20))   # v7x-safe cap

    grid_spec = pltpu.PrefetchScalarGridSpec(
        num_scalar_prefetch=0,
        grid=(nb, nk),
        in_specs=[
            pl.BlockSpec((bt, tk), lambda b, k: (b, k)),           # x
            pl.BlockSpec((tk, HIDDEN), lambda b, k: (k, 0)),       # w0
            pl.BlockSpec((1, HIDDEN), lambda b, k: (0, 0)),        # b0
            pl.BlockSpec((HIDDEN, OUTP), lambda b, k: (0, 0)),     # w1
            pl.BlockSpec((1, OUTP), lambda b, k: (0, 0)),          # b1
            pl.BlockSpec((OUTP, 3 * LANES), lambda b, k: (0, 0)),  # GQC
            pl.BlockSpec((DOF_PAD, 2 * LANES), lambda b, k: (0, 0)),  # YM
            pl.BlockSpec((1, LANES), lambda b, k: (0, 0)),         # cZ
            pl.BlockSpec((bt, DOF_PAD), lambda b, k: (b, 0)),      # y0
        ],
        out_specs=pl.BlockSpec((bt, LANES), lambda b, k: (b, 0)),
        scratch_shapes=[pltpu.VMEM((bt, HIDDEN), jnp.float32)],
    )
    return pl.pallas_call(
        _fused_kernel,
        out_shape=jax.ShapeDtypeStruct((Bp, LANES), jnp.float32),
        grid_spec=grid_spec,
        compiler_params=pltpu.CompilerParams(
            dimension_semantics=("parallel", "arbitrary"),
            vmem_limit_bytes=vmem_limit),
        cost_estimate=pl.CostEstimate(flops=int(flops),
                                      transcendentals=int(Bp * HIDDEN),
                                      bytes_accessed=int(bytes_accessed)),
    )(x, w0, b0, w1, b1, gqc, ym, cz, y0p)


# ---------------- full forward (thin glue in JAX) ----------------
def _round_up(v, m):
    return ((v + m - 1) // m) * m


def dmp_net_forward(params, image, state):
    B = image.shape[0]
    x = image.reshape(B, -1).astype(jnp.bfloat16)                 # (B, Din)
    Din = x.shape[1]

    # batch padding / tiling (parallel grid axis; tiles split across v7x cores)
    if B > 128:
        Bp, bt = _round_up(B, 128), 128
    else:
        Bp = max(8, _round_up(B, 8)); bt = Bp
    # feature (K) padding / tiling (arbitrary grid axis; pipelines the w0 DMA)
    Dp = _round_up(Din, 128)
    tk = 128
    for cand in (512, 256):
        if Dp % cand == 0 and Dp // cand >= 2:
            tk = cand
            break

    xp = jnp.zeros((Bp, Dp), jnp.bfloat16).at[:B, :Din].set(x)
    w0 = params['w0']
    if Dp != Din:
        w0 = jnp.zeros((Dp, HIDDEN), w0.dtype).at[:Din].set(w0)
    y0p = jnp.zeros((Bp, DOF_PAD), jnp.float32)
    y0p = y0p.at[:B, :DOF].set(state[:, :DOF].astype(jnp.float32))

    Yflat = dmp_net_fused(xp, w0, params['b0'], params['w1'], params['b1'],
                          params['gqc'], params['ym'], params['cz'], y0p,
                          bt=bt, tk=tk)                           # (Bp, 128)
    # lane j = k*8 + d  ->  (B, T+1, DOF)  ==  y[:, :, ::l].transpose(1, 2)
    Y = Yflat[:B, :(T + 1) * DOF_PAD].reshape(B, T + 1, DOF_PAD)[:, :, :DOF]
    return Y


# ---------------- pure-JAX reference (explicit 100-step Euler, f32) ----------------
def reference_forward(params, image, state):
    B = image.shape[0]
    x = image.reshape(B, -1).astype(jnp.bfloat16).astype(jnp.float32)
    w0 = params['w0'].astype(jnp.float32)
    h = jnp.tanh(x @ w0 + params['b0'].astype(jnp.float32))
    w1 = params['w1'].astype(jnp.float32)[:, :OUT_DIM]
    b1 = params['b1'][0, :OUT_DIM]
    out = (h @ w1 + b1[None, :]) * SCALE                          # (B, 42)
    goal = out[:, :DOF].reshape(B * DOF)
    w = out[:, DOF:DOF * (N + 1)].reshape(B * DOF, N)
    y0 = state[:, :DOF].reshape(B * DOF).astype(jnp.float32)
    dy0 = jnp.ones_like(y0) * DY0
    f = (params['psi'] @ w.T) * (goal - y0)[None, :]              # (STEPS, B*DOF)
    ys = [y0]
    y, z = y0, dy0 * TAU
    for i in range(STEPS):
        dz = (A_Z * (B_Z * (goal - y) - z) + f[i]) * TAU
        dy = z * TAU
        y = y + dy * DT
        z = z + dz * DT
        ys.append(y)
    Y = jnp.stack(ys, axis=0)                                     # (TS, B*DOF)
    yv = Y.T.reshape(B, DOF, TS)[:, :, ::L]
    return jnp.transpose(yv, (0, 2, 1))


if __name__ == "__main__":
    key = jax.random.PRNGKey(0)
    kx, ks, kw0, kw1 = jax.random.split(key, 4)

    B, C, H, W = 2, 4, 16, 16
    DIN = C * H * W

    image = jax.random.normal(kx, (B, C, H, W), dtype=jnp.float32)   # NCHW
    state = jax.random.normal(ks, (B, 10), dtype=jnp.float32)        # >= 7 state dims

    basis = _dmp_basis()
    GQC, YM, CZ = _const_matrices(basis)

    # Deterministic synthetic parameters (orthogonal init replaced by scaled normal,
    # biases zero as in init_(..., constant_(x, 0))).  Weights stored bf16, padded
    # to the lane-dense shapes the fused kernel consumes.
    w0 = jax.random.normal(kw0, (DIN, HIDDEN), dtype=jnp.float32) / np.sqrt(DIN)
    w1 = jax.random.normal(kw1, (HIDDEN, OUT_DIM), dtype=jnp.float32) / np.sqrt(HIDDEN)
    w1p = jnp.zeros((HIDDEN, OUTP), jnp.float32).at[:, :OUT_DIM].set(w1)
    params = {
        'w0': w0.astype(jnp.bfloat16),                 # (Din, 256) bf16
        'b0': jnp.zeros((1, HIDDEN), jnp.float32),
        'w1': w1p.astype(jnp.bfloat16),                # (256, 128) bf16, cols>=42 zero
        'b1': jnp.zeros((1, OUTP), jnp.float32),
        'gqc': jnp.asarray(GQC),                       # (128, 384) f32 propagator
        'ym': jnp.asarray(YM),                         # (8, 256) f32 propagator
        'cz': jnp.asarray(CZ),                         # (1, 128) f32 propagator
        'psi': jnp.asarray(basis.astype(np.float32)),  # (100, 5) f32 (reference only)
    }

    y = jax.block_until_ready(dmp_net_forward(params, image, state))
    y_ref = jax.block_until_ready(reference_forward(params, image, state))

    assert y.shape == (B, T + 1, DOF), y.shape
    np.testing.assert_allclose(np.asarray(y), np.asarray(y_ref), rtol=5e-2, atol=5e-2)

    print("KERNEL_OK")
</pallas_src>

<mosaic_0001>
module attributes {stable_mosaic.version = 11 : i64} {
  func.func @_fused_kernel(%arg0: i32, %arg1: i32, %arg2: memref<8x512xbf16, #tpu.memory_space<vmem>>, %arg3: memref<512x256xbf16, #tpu.memory_space<vmem>>, %arg4: memref<1x256xf32, #tpu.memory_space<vmem>>, %arg5: memref<256x128xbf16, #tpu.memory_space<vmem>>, %arg6: memref<1x128xf32, #tpu.memory_space<vmem>>, %arg7: memref<128x384xf32, #tpu.memory_space<vmem>>, %arg8: memref<8x256xf32, #tpu.memory_space<vmem>>, %arg9: memref<1x128xf32, #tpu.memory_space<vmem>>, %arg10: memref<8x8xf32, #tpu.memory_space<vmem>>, %arg11: memref<8x128xf32, #tpu.memory_space<vmem>>, %arg12: memref<8x256xf32, #tpu.memory_space<vmem>>) attributes {dimension_semantics = [#tpu.dimension_semantics<parallel>, #tpu.dimension_semantics<arbitrary>], iteration_bounds = array<i64: 1, 2>, scalar_prefetch = 0 : i64, scratch_operands = 1 : i64, tpu.core_type = #tpu.core_type<tc>, window_params = [{transform_indices = @transform_0, window_bounds = array<i64: 8, 512>}, {transform_indices = @transform_1, window_bounds = array<i64: 512, 256>}, {pipeline_mode = #tpu.pipeline_mode<synchronous>, transform_indices = @transform_2, window_bounds = array<i64: 1, 256>}, {pipeline_mode = #tpu.pipeline_mode<synchronous>, transform_indices = @transform_3, window_bounds = array<i64: 256, 128>}, {pipeline_mode = #tpu.pipeline_mode<synchronous>, transform_indices = @transform_4, window_bounds = array<i64: 1, 128>}, {pipeline_mode = #tpu.pipeline_mode<synchronous>, transform_indices = @transform_5, window_bounds = array<i64: 128, 384>}, {pipeline_mode = #tpu.pipeline_mode<synchronous>, transform_indices = @transform_6, window_bounds = array<i64: 8, 256>}, {pipeline_mode = #tpu.pipeline_mode<synchronous>, transform_indices = @transform_7, window_bounds = array<i64: 1, 128>}, {transform_indices = @transform_8, window_bounds = array<i64: 8, 8>}, {transform_indices = @transform_9, window_bounds = array<i64: 8, 128>}]} {
    %c0_i32 = arith.constant 0 : i32
    %0 = arith.cmpi eq, %arg1, %c0_i32 : i32
    %1 = arith.extui %0 : i1 to i32
    %c0_i32_0 = arith.constant 0 : i32
    %2 = arith.cmpi ne, %1, %c0_i32_0 : i32
    scf.if %2 {
      %c0_9 = arith.constant 0 : index
      %c0_10 = arith.constant 0 : index
      %12 = vector.load %arg4[%c0_9, %c0_10] : memref<1x256xf32, #tpu.memory_space<vmem>>, vector<1x256xf32>
      %13 = vector.shape_cast %12 : vector<1x256xf32> to vector<1x256xf32>
      %14 = vector.broadcast %13 : vector<1x256xf32> to vector<8x256xf32>
      %c0_11 = arith.constant 0 : index
      %c0_12 = arith.constant 0 : index
      %15 = vector.load %arg12[%c0_11, %c0_12] : memref<8x256xf32, #tpu.memory_space<vmem>>, vector<8x256xf32>
      tpu.vector_store %arg12[%c0_11, %c0_12], %14 {strides = array<i32>} : memref<8x256xf32, #tpu.memory_space<vmem>>, vector<8x256xf32>,
    } else {
    }
    %c0 = arith.constant 0 : index
    %c0_1 = arith.constant 0 : index
    %3 = vector.load %arg12[%c0, %c0_1] : memref<8x256xf32, #tpu.memory_space<vmem>>, vector<8x256xf32>
    %c0_2 = arith.constant 0 : index
    %c0_3 = arith.constant 0 : index
    %4 = vector.load %arg2[%c0_2, %c0_3] : memref<8x512xbf16, #tpu.memory_space<vmem>>, vector<8x512xbf16>
    %c0_4 = arith.constant 0 : index
    %c0_5 = arith.constant 0 : index
    %5 = vector.load %arg3[%c0_4, %c0_5] : memref<512x256xbf16, #tpu.memory_space<vmem>>, vector<512x256xbf16>
    %cst = arith.constant dense<0.000000e+00> : vector<8x256xf32>
    %6 = tpu.matmul %4, %5, %cst {dimension_numbers = #tpu.dot_dimension_numbers<[1], [0], [0], [1], [0, 0, 1, 1], [], []>} : vector<8x512xbf16>, vector<512x256xbf16>, vector<8x256xf32> -> vector<8x256xf32>
    %7 = arith.addf %3, %6 : vector<8x256xf32>
    %c0_6 = arith.constant 0 : index
    %c0_7 = arith.constant 0 : index
    %8 = vector.load %arg12[%c0_6, %c0_7] : memref<8x256xf32, #tpu.memory_space<vmem>>, vector<8x256xf32>
    tpu.vector_store %arg12[%c0_6, %c0_7], %7 {strides = array<i32>} : memref<8x256xf32, #tpu.memory_space<vmem>>, vector<8x256xf32>,
    %c1_i32 = arith.constant 1 : i32
    %9 = arith.cmpi eq, %arg1, %c1_i32 : i32
    %10 = arith.extui %9 : i1 to i32
    %c0_i32_8 = arith.constant 0 : i32
    %11 = arith.cmpi ne, %10, %c0_i32_8 : i32
    scf.if %11 {
      %c0_9 = arith.constant 0 : index
      %c0_10 = arith.constant 0 : index
      %12 = vector.load %arg12[%c0_9, %c0_10] : memref<8x256xf32, #tpu.memory_space<vmem>>, vector<8x256xf32>
      %13 = math.tanh %12 : vector<8x256xf32>
      %14 = arith.truncf %13 : vector<8x256xf32> to vector<8x256xbf16>
      %c0_11 = arith.constant 0 : index
      %c0_12 = arith.constant 0 : index
      %15 = vector.load %arg5[%c0_11, %c0_12] : memref<256x128xbf16, #tpu.memory_space<vmem>>, vector<256x128xbf16>
      %cst_13 = arith.constant dense<0.000000e+00> : vector<8x128xf32>
      %16 = tpu.matmul %14, %15, %cst_13 {dimension_numbers = #tpu.dot_dimension_numbers<[1], [0], [0], [1], [0, 0, 1, 1], [], []>} : vector<8x256xbf16>, vector<256x128xbf16>, vector<8x128xf32> -> vector<8x128xf32>
      %c0_14 = arith.constant 0 : index
      %c0_15 = arith.constant 0 : index
      %17 = vector.load %arg6[%c0_14, %c0_15] : memref<1x128xf32, #tpu.memory_space<vmem>>, vector<1x128xf32>
      %18 = vector.broadcast %17 : vector<1x128xf32> to vector<8x128xf32>
      %19 = arith.addf %16, %18 : vector<8x128xf32>
      %c0_16 = arith.constant 0 : index
      %c0_17 = arith.constant 0 : index
      %20 = vector.load %arg7[%c0_16, %c0_17] : memref<128x384xf32, #tpu.memory_space<vmem>>, vector<128x384xf32>
      %cst_18 = arith.constant dense<0.000000e+00> : vector<8x384xf32>
      %21 = tpu.matmul %19, %20, %cst_18 {dimension_numbers = #tpu.dot_dimension_numbers<[1], [0], [0], [1], [0, 0, 1, 1], [], []>} : vector<8x128xf32>, vector<128x384xf32>, vector<8x384xf32> -> vector<8x384xf32>
      %c0_19 = arith.constant 0 : index
      %c0_20 = arith.constant 0 : index
      %22 = vector.load %arg10[%c0_19, %c0_20] : memref<8x8xf32, #tpu.memory_space<vmem>>, vector<8x8xf32>
      %c0_21 = arith.constant 0 : index
      %c0_22 = arith.constant 0 : index
      %23 = vector.load %arg8[%c0_21, %c0_22] : memref<8x256xf32, #tpu.memory_space<vmem>>, vector<8x256xf32>
      %cst_23 = arith.constant dense<0.000000e+00> : vector<8x256xf32>
      %24 = tpu.matmul %22, %23, %cst_23 {dimension_numbers = #tpu.dot_dimension_numbers<[1], [0], [0], [1], [0, 0, 1, 1], [], []>} : vector<8x8xf32>, vector<8x256xf32>, vector<8x256xf32> -> vector<8x256xf32>
      %25 = vector.extract_strided_slice %21 {offsets = [0, 0], sizes = [8, 128], strides = [1, 1]} : vector<8x384xf32> to vector<8x128xf32>
      %26 = vector.extract_strided_slice %21 {offsets = [0, 128], sizes = [8, 128], strides = [1, 1]} : vector<8x384xf32> to vector<8x128xf32>
      %27 = vector.extract_strided_slice %21 {offsets = [0, 256], sizes = [8, 128], strides = [1, 1]} : vector<8x384xf32> to vector<8x128xf32>
      %28 = vector.extract_strided_slice %24 {offsets = [0, 0], sizes = [8, 128], strides = [1, 1]} : vector<8x256xf32> to vector<8x128xf32>
      %29 = vector.extract_strided_slice %24 {offsets = [0, 128], sizes = [8, 128], strides = [1, 1]} : vector<8x256xf32> to vector<8x128xf32>
      %30 = arith.addf %29, %27 : vector<8x128xf32>
      %c0_24 = arith.constant 0 : index
      %c0_25 = arith.constant 0 : index
      %31 = vector.load %arg9[%c0_24, %c0_25] : memref<1x128xf32, #tpu.memory_space<vmem>>, vector<1x128xf32>
      %32 = vector.broadcast %31 : vector<1x128xf32> to vector<8x128xf32>
      %33 = arith.addf %30, %32 : vector<8x128xf32>
      %34 = arith.subf %25, %28 : vector<8x128xf32>
      %35 = arith.mulf %34, %26 : vector<8x128xf32>
      %36 = arith.addf %33, %35 : vector<8x128xf32>
      %c0_26 = arith.constant 0 : index
      %c0_27 = arith.constant 0 : index
      %37 = vector.load %arg11[%c0_26, %c0_27] : memref<8x128xf32, #tpu.memory_space<vmem>>, vector<8x128xf32>
      tpu.vector_store %arg11[%c0_26, %c0_27], %36 {strides = array<i32>} : memref<8x128xf32, #tpu.memory_space<vmem>>, vector<8x128xf32>,
    } else {
    }
    return
  }
  func.func @transform_0(%arg0: i32, %arg1: i32) -> (i32, i32) {
    %c0_i32 = arith.constant 0 : i32
    return %arg0, %arg1 : i32, i32
  }
  func.func @transform_1(%arg0: i32, %arg1: i32) -> (i32, i32) {
    %c0_i32 = arith.constant 0 : i32
    %c0_i32_0 = arith.constant 0 : i32
    return %arg1, %c0_i32 : i32, i32
  }
  func.func @transform_2(%arg0: i32, %arg1: i32) -> (i32, i32) {
    %c0_i32 = arith.constant 0 : i32
    %c0_i32_0 = arith.constant 0 : i32
    %c0_i32_1 = arith.constant 0 : i32
    return %c0_i32, %c0_i32_0 : i32, i32
  }
  func.func @transform_3(%arg0: i32, %arg1: i32) -> (i32, i32) {
    %c0_i32 = arith.constant 0 : i32
    %c0_i32_0 = arith.constant 0 : i32
    %c0_i32_1 = arith.constant 0 : i32
    return %c0_i32, %c0_i32_0 : i32, i32
  }
  func.func @transform_4(%arg0: i32, %arg1: i32) -> (i32, i32) {
    %c0_i32 = arith.constant 0 : i32
    %c0_i32_0 = arith.constant 0 : i32
    %c0_i32_1 = arith.constant 0 : i32
    return %c0_i32, %c0_i32_0 : i32, i32
  }
  func.func @transform_5(%arg0: i32, %arg1: i32) -> (i32, i32) {
    %c0_i32 = arith.constant 0 : i32
    %c0_i32_0 = arith.constant 0 : i32
    %c0_i32_1 = arith.constant 0 : i32
    return %c0_i32, %c0_i32_0 : i32, i32
  }
  func.func @transform_6(%arg0: i32, %arg1: i32) -> (i32, i32) {
    %c0_i32 = arith.constant 0 : i32
    %c0_i32_0 = arith.constant 0 : i32
    %c0_i32_1 = arith.constant 0 : i32
    return %c0_i32, %c0_i32_0 : i32, i32
  }
  func.func @transform_7(%arg0: i32, %arg1: i32) -> (i32, i32) {
    %c0_i32 = arith.constant 0 : i32
    %c0_i32_0 = arith.constant 0 : i32
    %c0_i32_1 = arith.constant 0 : i32
    return %c0_i32, %c0_i32_0 : i32, i32
  }
  func.func @transform_8(%arg0: i32, %arg1: i32) -> (i32, i32) {
    %c0_i32 = arith.constant 0 : i32
    %c0_i32_0 = arith.constant 0 : i32
    return %arg0, %c0_i32 : i32, i32
  }
  func.func @transform_9(%arg0: i32, %arg1: i32) -> (i32, i32) {
    %c0_i32 = arith.constant 0 : i32
    %c0_i32_0 = arith.constant 0 : i32
    return %arg0, %c0_i32 : i32, i32
  }
}

</mosaic_0001>

<bundles_post_ra>
// kernel: tpu_custom_call.1
= control target key start
LH: loop header
LB: loop body
LE: loop exit
PB: predicated region body
PF: predicated region fallthrough
CT: control target
= control target key end

     0   :  { %s2816_s0 = inlined_call_operand.hbm [shape: bf16[8,1024], index: 0, kind: input, shape index: {}]   ;;  %s2817_s1 = inlined_call_operand.hbm [shape: bf16[1024,256], index: 1, kind: input, shape index: {}]   ;;  %s2818_s2 = inlined_call_operand.vmem [shape: f32[1,256], index: 2, kind: input, shape index: {}]   ;;  %s2819_s3 = inlined_call_operand.hbm [shape: bf16[256,128], index: 3, kind: input, shape index: {}]   ;;  %s2820_s4 = inlined_call_operand.hbm [shape: f32[1,128], index: 4, kind: input, shape index: {}]   ;;  %s2821_s5 = inlined_call_operand.hbm [shape: f32[128,384], index: 5, kind: input, shape index: {}]   ;;  %s2822_s6 = inlined_call_operand.vmem [shape: f32[8,256], index: 6, kind: input, shape index: {}]   ;;  %s2823_s7 = inlined_call_operand.hbm [shape: f32[1,128], index: 7, kind: input, shape index: {}]   ;;  %s2824_s8 = inlined_call_operand.vmem [shape: f32[8,8], index: 8, kind: input, shape index: {}]   ;;  %s2825_s9 = inlined_call_operand.hbm [shape: f32[8,128], index: 9, kind: output, shape index: {}]  }
   0x1   :  { %2830 = sst [smem:[#allocation21_spill]] %s2816_s0 }
   0x2   :  { %2831 = sst [smem:[#allocation22_spill]] %s2822_s6 }
   0x3   :  { %2832 = sst [smem:[#allocation23_spill]] %s2824_s8 }
   0x4   :  { %2833 = sst [smem:[#allocation24_spill]] %s2825_s9 }
   0x5   :  { %14 = vsyncpa [#allocation4], 0 }
   0x6   :  { %16 = vsyncpa [#allocation4 + $0x1], 0 }
   0x7   :  { %17 = vsyncpa [#allocation7], 0 }
   0x8   :  { %19 = vsyncpa [#allocation7 + $0x1], 0 }
   0x9   :  { %20 = vsyncpa [#allocation10], 0 }
   0xa   :  { %21 = vsyncpa [#allocation13], 0 }
   0xb   :  { %22 = vsyncpa [#allocation5], 0  ;;  %s2414_s30 = smov 0   ;;  %s2416_s10 = smov 0  }
   0xc   :  { %s2418_s11 = smov 0   ;;  %s2420_s12 = smov 0  }
   0xd   :  { %s2422_s13 = smov 0   ;;  %s2424_s14 = smov 0  }
   0xe LB: > { %s2445_s15 = sadd.s32 4294967295, %s2346_s14   ;;  %p1594_p0 = scmp.ge.s32.totalorder %s2346_s14, 1  ;;  %s2346_s14 = sphi %s2424_s14, %s28_s14   ;;  %s2342_s13 = sphi %s2422_s13, %s2856_s13   ;;  %s2338_s12 = sphi %s2420_s12, %s2855_s12   ;;  %s2334_s11 = sphi %s2418_s11, %s2854_s11   ;;  %s2330_s10 = sphi %s2416_s10, %s2853_s10   ;;  %s2326_s30 = sphi %s2414_s30, %s2852_s30  }
   0xf   : > { %p2828_p1 = scmp.eq.s32.totalorder %s2445_s15, 0  ;;  %p277_p2 = scmp.lt.s32.totalorder %s2346_s14, 3 }
  0x10   : > { %s2348_s17 = smov [#allocation8]   ;;  %s2349_s20 = smov [#allocation9]  }
  0x11   : > { %p2450_p3 = pnand %p1594_p0, %p277_p2  ;;  %s292_s18 = sshll.u32 %s2348_s17, 4  ;;  %s2454_s18 = int_to_ptr.vmem [resolvable:$true] %s292_s18 }
  0x12   : > { %s306_s21 = sshll.u32 %s2349_s20, 4  ;;  %s2350_s22 = smov [#allocation11]   ;;  %s2464_s21 = int_to_ptr.vmem [resolvable:$true] %s306_s21 }
  0x13   : > { %s2834_s16 = scalar_select %p2450_p3, 1, 0 }
  0x14   : > { %p1865_p4 = pneg %p2450_p3  ;;  %s2466_s23 = sshll.u32 %s2350_s22, 4  ;;  %s317_s23 = int_to_ptr.vmem [resolvable:$true] %s2466_s23 }
  0x15   : > { %s2078_s26 = scalar_lea.hbm %s2819_s3, 2048 }
  0x16   : > { %p2460_p5 = pnand %p1865_p4, %p2828_p1  ;;  %p2079_p6 = scmp.ne.s32.totalorder %s2819_s3, %s2078_s26 }
  0x17   : > { %p2085_p10 = scmp.lt.u32.totalorder %s2078_s26, %s2819_s3 }
  0x18   : > { %p2476_p7 = pneg %p2460_p5 }
  0x1a   : > { %p2081_p8 = pnand %p2476_p7, %p2079_p6 }
  0x1c   : > { %p2082_p9 = pneg %p2081_p8 }
  0x1e   : > { %p2087_p11 = pnand %p2085_p10, %p2082_p9 }
  0x20   : > { %2090 = shalt.err (!%p2087_p11)
}
  0x21   : > { %s2091_s22 = scalar_lea.vmem %s2454_s18, 2048  ;;  %p2099_p2 = scmp.lt.s32.totalorder %s2454_s18, %s2454_s18 }
  0x22   : > { %p2092_p12 = scmp.ne.s32.totalorder %s2454_s18, %s2091_s22  ;;  %p2100_p4 = scmp.lt.s32.totalorder %s2091_s22, %s2091_s22 }
  0x24   : > { %p2094_p13 = pnand %p2092_p12, %p2476_p7  ;;  %p2101_p6 = por %p2100_p4, %p2099_p2 }
  0x26   : > { %p2095_p0 = pneg %p2094_p13 }
  0x28   : > { %p2102_p8 = pnand %p2101_p6, %p2095_p0 }
  0x2a   : > { %2105 = shalt.err (!%p2102_p8)
}
  0x2b   : > { %s2351_s24 = smov 64   ;;  %s2352_s25 = smov 4  }
  0x2c   : > { %1868 = dma.hbm_to_vmem [thread:$0]  (!%p2460_p5), %s2819_s3, 2048, %s2454_s18, [#allocation7], %s2351_s24, %s2351_s24, %s2352_s25  }
  0x2d   : > { %s2106_s20 = scalar_lea.hbm %s2820_s4, 16 }
  0x2e   : > { %p2107_p9 = scmp.ne.s32.totalorder %s2820_s4, %s2106_s20  ;;  %p2113_p12 = scmp.lt.u32.totalorder %s2106_s20, %s2820_s4 }
  0x30   : > { %p2109_p10 = pnand %p2107_p9, %p2476_p7 }
  0x32   : > { %p2110_p11 = pneg %p2109_p10 }
  0x34   : > { %p2115_p13 = pnand %p2113_p12, %p2110_p11 }
  0x36   : > { %2118 = shalt.err (!%p2115_p13)
}
  0x37   : > { %s2119_s18 = scalar_lea.vmem %s2464_s21, 16  ;;  %s2126_s8 = scalar_lea.vmem %s2464_s21, 32 }
  0x38   : > { %p2120_p0 = scmp.ne.s32.totalorder %s2464_s21, %s2119_s18  ;;  %p2127_p6 = scmp.lt.s32.totalorder %s2464_s21, %s2464_s21 }
  0x39   : > { %p2128_p8 = scmp.lt.s32.totalorder %s2126_s8, %s2119_s18 }
  0x3a   : > { %p2122_p2 = pnand %p2120_p0, %p2476_p7 }
  0x3b   : > { %p2129_p9 = por %p2128_p8, %p2127_p6 }
  0x3c   : > { %p2123_p4 = pneg %p2122_p2 }
  0x3e   : > { %p2130_p10 = pnand %p2129_p9, %p2123_p4 }
  0x40   : > { %2133 = shalt.err (!%p2130_p10)
}
  0x41   : > { %1871 = dma.hbm_to_vmem [thread:$0]  (!%p2460_p5), %s2820_s4, 16, %s2464_s21, [#allocation10]  }
  0x42   : > { %s2134_s26 = scalar_lea.hbm %s2821_s5, 6144 }
  0x43   : > { %p2135_p11 = scmp.ne.s32.totalorder %s2821_s5, %s2134_s26  ;;  %p2141_p0 = scmp.lt.u32.totalorder %s2134_s26, %s2821_s5 }
  0x45   : > { %p2137_p12 = pnand %p2135_p11, %p2476_p7 }
  0x47   : > { %p2138_p13 = pneg %p2137_p12 }
  0x49   : > { %p2143_p2 = pnand %p2141_p0, %p2138_p13 }
  0x4b   : > { %2146 = shalt.err (!%p2143_p2)
}
  0x4c   : > { %s2147_s22 = scalar_lea.vmem %s317_s23, 6144  ;;  %p2155_p9 = scmp.lt.s32.totalorder %s317_s23, %s317_s23 }
  0x4d   : > { %p2148_p4 = scmp.ne.s32.totalorder %s317_s23, %s2147_s22  ;;  %p2156_p10 = scmp.lt.s32.totalorder %s2147_s22, %s2147_s22 }
  0x4f   : > { %p2150_p6 = pnand %p2148_p4, %p2476_p7  ;;  %p2157_p1 = por %p2156_p10, %p2155_p9 }
  0x51   : > { %p2151_p8 = pneg %p2150_p6 }
  0x53   : > { %p2158_p3 = pnand %p2157_p1, %p2151_p8 }
  0x55   : > { %2161 = shalt.err (!%p2158_p3)
}
  0x56   : > { %s2353_s21 = smov 384   ;;  %s2354_s18 = smov 24  }
  0x57   : > { %1874 = dma.hbm_to_vmem [thread:$0]  (!%p2460_p5), %s2821_s5, 6144, %s317_s23, [#allocation10], %s2353_s21, %s2353_s21, %s2354_s18  }
  0x58   : > { %s2355_s9 = smov [#allocation12]   ;;  %s2162_s27 = scalar_lea.hbm %s2823_s7, 16 }
  0x59   : > { %s333_s24 = sshll.u32 %s2355_s9, 4  ;;  %p2163_p1 = scmp.ne.s32.totalorder %s2823_s7, %s2162_s27  ;;  %s334_s24 = int_to_ptr.vmem [resolvable:$true] %s333_s24 }
  0x5a   : > { %p2169_p12 = scmp.lt.u32.totalorder %s2162_s27, %s2823_s7 }
  0x5b   : > { %p2165_p3 = pnand %p2163_p1, %p2476_p7 }
  0x5d   : > { %p2166_p11 = pneg %p2165_p3 }
  0x5f   : > { %p2171_p13 = pnand %p2169_p12, %p2166_p11 }
  0x61   : > { %2174 = shalt.err (!%p2171_p13)
}
  0x62   : > { %s2175_s23 = scalar_lea.vmem %s334_s24, 16  ;;  %s2182_s21 = scalar_lea.vmem %s334_s24, 32 }
  0x63   : > { %p2176_p0 = scmp.ne.s32.totalorder %s334_s24, %s2175_s23  ;;  %p2183_p6 = scmp.lt.s32.totalorder %s334_s24, %s334_s24 }
  0x64   : > { %p2184_p8 = scmp.lt.s32.totalorder %s2182_s21, %s2175_s23 }
  0x65   : > { %p2178_p2 = pnand %p2176_p0, %p2476_p7 }
  0x66   : > { %p2185_p9 = por %p2184_p8, %p2183_p6 }
  0x67   : > { %p2179_p4 = pneg %p2178_p2 }
  0x69   : > { %p2186_p10 = pnand %p2185_p9, %p2179_p4 }
  0x6b   : > { %2189 = shalt.err (!%p2186_p10)
}
  0x6c   : > { %1877 = dma.hbm_to_vmem [thread:$0]  (!%p2460_p5), %s2823_s7, 16, %s334_s24, [#allocation13]  }
  0x6d   : > { %s37_s29 = sadd.s32 1, %s2342_s13  ;;  %s49_s6 = sadd.s32 1, %s2334_s11 }
  0x6e   : > { %p38_p7 = scmp.ge.s32.totalorder %s37_s29, 2  ;;  %p56_p1 = scmp.ne.s32.totalorder %s2334_s11, %s2330_s10 }
  0x6f   : > { %p57_p3 = scmp.eq.s32.totalorder %s2346_s14, 0  ;;  %p62_p11 = scmp.ne.s32.totalorder %s2330_s10, %s2326_s30 }
  0x70   : > { %s2858_s29 = smov (%p38_p7, %s37_s29), 0  ;;  %p2838_p13 = scmp.eq.s32.totalorder %s2445_s15, 0 }
  0x71   : > { %p2567_p12 = por %p57_p3, %p56_p1  ;;  %s45_s24 = ssub.s32 %s2342_s13, %s2858_s29 }
  0x72   : > { %p2573_p0 = por %p2838_p13, %p62_p11  ;;  %p1889_p5 = scmp.lt.s32.totalorder %s2346_s14, 2 }
  0x73   : > { %p47_p2 = scmp.eq.s32.totalorder %s45_s24, 0  ;;  %s2581_s25 = sand.u32 1, %s2334_s11  }
  0x74   : > { %s1601_s30 = sshll.u32 %s2581_s25, 4  ;;  %s1708_s27 = sshll.u32 %s2342_s13, 8 }
  0x75   : > { %s2585_s26 = scalar_select %p47_p2, %s2334_s11, %s49_s6  }
  0x76   : > { %s2840_s0 = sld [smem:[#allocation21_spill]]  ;;  %s355_s22 = scalar_lea.vmem [#allocation3], %s1601_s30 }
  0x77   : > { %s365_s23 = sshll.u32 %s355_s22, 4  ;;  %p2597_p4 = pnand %p1889_p5, %p2567_p12  ;;  %s2593_s23 = int_to_ptr.vmem [resolvable:$true] %s365_s23 }
  0x78   : > { %s1604_s18 = sshll.u32 %s2581_s25, 9  ;;  %s1710_s8 = sshll.u32 %s2342_s13, 13 }
  0x79   : > { %s352_s6 = scalar_lea.sflag [#allocation4], %s2581_s25  ;;  %p2192_p8 = pneg %p2597_p4 }
  0x7c   : > { %s2591_s20 = scalar_lea.hbm %s2840_s0, %s1708_s27  ;;  %s2195_s19 = scalar_lea.hbm %s2840_s0, 512 }
  0x7d   : > { %s2190_s24 = scalar_lea.hbm %s2591_s20, 256  ;;  %p2196_p7 = scmp.lt.u32.totalorder %s2591_s20, %s2840_s0 }
  0x7e   : > { %p2191_p6 = scmp.ne.s32.totalorder %s2591_s20, %s2190_s24  ;;  %p2197_p1 = scmp.lt.u32.totalorder %s2195_s19, %s2190_s24 }
  0x7f   : > { %p2199_p11 = scmp.lt.u32.totalorder %s2190_s24, %s2591_s20 }
  0x80   : > { %p2193_p9 = pnand %p2192_p8, %p2191_p6  ;;  %p2198_p3 = por %p2197_p1, %p2196_p7 }
  0x82   : > { %p2194_p10 = pneg %p2193_p9  ;;  %p2200_p12 = por %p2199_p11, %p2198_p3 }
  0x84   : > { %p2201_p13 = pnand %p2200_p12, %p2194_p10 }
  0x86   : > { %2204 = shalt.err (!%p2201_p13)
}
  0x87   : > { %s2205_s22 = scalar_lea.vmem %s2593_s23, 256  ;;  %s2356_s30 = smov [#allocation3]  }
  0x88   : > { %p2206_p5 = scmp.ne.s32.totalorder %s2593_s23, %s2205_s22  ;;  %s2210_s27 = sshll.u32 %s2356_s30, 4  ;;  %s2211_s27 = int_to_ptr.vmem [resolvable:$false] %s2210_s27 }
  0x89   : > { %s2212_s28 = scalar_lea.vmem %s2211_s27, 512  ;;  %p2213_p9 = scmp.lt.s32.totalorder %s2593_s23, %s2211_s27 }
  0x8a   : > { %p2208_p2 = pnand %p2206_p5, %p2192_p8  ;;  %p2214_p7 = scmp.lt.s32.totalorder %s2212_s28, %s2205_s22 }
  0x8c   : > { %p2209_p6 = pneg %p2208_p2  ;;  %p2215_p1 = por %p2214_p7, %p2213_p9 }
  0x8e   : > { %p2216_p3 = pnand %p2215_p1, %p2209_p6 }
  0x90   : > { %2219 = shalt.err (!%p2216_p3)
}
  0x91   : > { %1881 = dma.hbm_to_vmem [thread:$0]  (!%p2597_p4), %s2591_s20, 256, %s2593_s23, %s352_s6  }
  0x92   : > { %s376_s24 = scalar_lea.vmem [#allocation6], %s1604_s18  ;;  %s372_s17 = sand.u32 1, %s2346_s14  }
  0x93   : > { %s384_s19 = sshll.u32 %s376_s24, 4  ;;  %s2639_s27 = scalar_lea.hbm %s2817_s1, %s1710_s8  ;;  %s2632_s19 = int_to_ptr.vmem [resolvable:$true] %s384_s19 }
  0x94   : > { %s2641_s28 = scalar_lea.sflag [#allocation7], %s372_s17  ;;  %s2220_s0 = scalar_lea.hbm %s2639_s27, 8192 }
  0x95   : > { %p2221_p10 = scmp.ne.s32.totalorder %s2639_s27, %s2220_s0  ;;  %s2225_s23 = scalar_lea.hbm %s2817_s1, 16384 }
  0x96   : > { %p2226_p13 = scmp.lt.u32.totalorder %s2639_s27, %s2817_s1  ;;  %p2227_p5 = scmp.lt.u32.totalorder %s2225_s23, %s2220_s0 }
  0x97   : > { %p2223_p11 = pnand %p2221_p10, %p2192_p8  ;;  %p2229_p6 = scmp.lt.u32.totalorder %s2220_s0, %s2639_s27 }
  0x98   : > { %p2228_p2 = por %p2227_p5, %p2226_p13 }
  0x99   : > { %p2224_p12 = pneg %p2223_p11 }
  0x9a   : > { %p2230_p9 = por %p2229_p6, %p2228_p2 }
  0x9c   : > { %p2231_p7 = pnand %p2230_p9, %p2224_p12 }
  0x9e   : > { %2234 = shalt.err (!%p2231_p7)
}
  0x9f   : > { %s2235_s8 = scalar_lea.vmem %s2632_s19, 8192  ;;  %s2357_s24 = smov [#allocation6]  }
  0xa0   : > { %p2236_p1 = scmp.ne.s32.totalorder %s2632_s19, %s2235_s8  ;;  %s2240_s17 = sshll.u32 %s2357_s24, 4  ;;  %s2241_s17 = int_to_ptr.vmem [resolvable:$false] %s2240_s17 }
  0xa1   : > { %s2242_s22 = scalar_lea.vmem %s2241_s17, 16384  ;;  %p2243_p11 = scmp.lt.s32.totalorder %s2632_s19, %s2241_s17 }
  0xa2   : > { %p2238_p3 = pnand %p2236_p1, %p2192_p8  ;;  %p2244_p13 = scmp.lt.s32.totalorder %s2242_s22, %s2235_s8 }
  0xa4   : > { %p2239_p10 = pneg %p2238_p3  ;;  %p2245_p5 = por %p2244_p13, %p2243_p11 }
  0xa6   : > { %p2246_p2 = pnand %p2245_p5, %p2239_p10 }
  0xa8   : > { %2249 = shalt.err (!%p2246_p2)
}
  0xa9   : > { %s2358_s0 = smov 128   ;;  %s2359_s30 = smov 8  }
  0xaa   : > { %1884 = dma.hbm_to_vmem [thread:$0]  (!%p2597_p4), %s2639_s27, 8192, %s2632_s19, %s2641_s28, %s2358_s0, %s2358_s0, %s2359_s30  }
  0xab   : > { %p2842_p8 = scmp.ne.s32.totalorder %s2834_s16, 0 }
  0xac   : > { %s398_s25 = sand.u32 (!%p2842_p8), 1, %s2330_s10  }
  0xad   : > { %396 = sbr.rel (%p2842_p8) target bundleno = 980 (0x3d4), region = 56  ;;  %s1609_s20 = sshll.u32 (!%p2842_p8), %s398_s25, 4 }
  0xae   : > { %s399_s23 = scalar_lea.sflag (!%p2842_p8), [#allocation4], %s398_s25  ;;  %s2670_s18 = scalar_lea.vmem (!%p2842_p8), [#allocation3], %s1609_s20 }
  0xb4   : > { %2301 = dma.done.wait (%p2573_p0), %s399_s23, 256  }
  0xb5   : > { %2303 = vsyncadd (%p2573_p0), %s399_s23, 4294967040  ;;  %s407_s6 = sand.u32 1, %s2445_s15   ;;  %s1610_s21 = sshll.u32 %s398_s25, 9 }
  0xb6   : > { %s408_s19 = scalar_lea.sflag [#allocation7], %s407_s6  ;;  %s2677_s27 = scalar_lea.vmem [#allocation6], %s1610_s21 }
  0xb7   : > { %2305 = dma.done.wait (%p2573_p0), %s408_s19, 8192  }
  0xb8   : > { %2307 = vsyncadd (%p2573_p0), %s408_s19, 4294959104  ;;  %p2843_p4 = scmp.eq.s32.totalorder %s2445_s15, 0 }
  0xba   : > { %2309 = dma.done.wait (%p2843_p4), [#allocation7], 2048   ;;  %p2844_p12 = pmov %p2843_p4 }
  0xbb   : > { %p2845_p6 = pmov %p2843_p4 }
  0xbc   : > { %2311 = vsyncadd (%p2844_p12), [#allocation7], 4294965248 }
  0xbd   : > { %2313 = dma.done.wait (%p2845_p6), [#allocation10], 6160   ;;  %p2846_p9 = pmov %p2843_p4 }
  0xbe   : > { %p2847_p7 = pmov %p2843_p4 }
  0xbf   : > { %2315 = vsyncadd (%p2846_p9), [#allocation10], 4294961136 }
  0xc0   : > { %2317 = dma.done.wait (%p2847_p7), [#allocation13], 16   ;;  %p2848_p1 = pmov %p2843_p4 }
  0xc1   : > { %p1615_p0 = scmp.ne.s32.totalorder %s2338_s12, 0 }
  0xc2   : > { %2319 = vsyncadd (%p2848_p1), [#allocation13], 4294967280  ;;  %v479_v0 = vlaneseq (!%p1615_p0)  ;;  %v477_v2 = vld [vmem:[%s2818_s2] sm:$0x3] (!%p1615_p0) }
  0xc3   : > { %476 = sbr.rel (%p1615_p0) target bundleno = 203 (0xcb), region = 84 }
  0xc4   : > { %v480_v1 = vshrl.u32 (!%p1615_p0), %v479_v0, 7 }
  0xc6   : > { %v481_v3 = vsub.s32 (!%p1615_p0), 0, %v480_v1  ;;  %v485_v4 = vsub.s32 (!%p1615_p0), 1, %v480_v1 }
  0xc8   : > { %v482_v5 = vrot.slane (!%p1615_p0), %v477_v2, %v481_v3  ;;  %v486_v6 = vrot.slane (!%p1615_p0), %v477_v2, %v485_v4 }
  0xca   : > { %489 = vst [vmem:[#allocation2] sm:$0xff] %v482_v5  ;;  %490 = vst [vmem:[#allocation2 + $0x8] sm:$0xff] %v486_v6 }
  0xcb PF: > { %v1958_v7 = vld [vmem:[%s2677_s27 + $0x4] ss:$8 sps:$4 sm:$0xff]   ;;  %v1962_v9 = vld [vmem:[%s2677_s27] ss:$8 sps:$4 sm:$0xff]   ;;  %v1964_v11 = vld [vmem:[%s2677_s27 + $0x14] ss:$8 sps:$4 sm:$0xff]  }
  0xcc   : > { %v1960_v8 = vld [vmem:[%s2677_s27 + $0x104] ss:$8 sps:$4 sm:$0xff]   ;;  %893 = vmatprep.subr.bf16.mxu0 %v1958_v7  ;;  %v1963_v10 = vld [vmem:[%s2677_s27 + $0x100] ss:$8 sps:$4 sm:$0xff]   ;;  %v1966_v12 = vld [vmem:[%s2677_s27 + $0x114] ss:$8 sps:$4 sm:$0xff]  }
  0xcd   : > { %934 = vmatprep.subr.bf16.mxu1 %v1960_v8  ;;  %894 = vmatpush1.bf16.msra.mxu0 %v1962_v9  ;;  %v1968_v13 = vld [vmem:[%s2677_s27 + $0x10] ss:$8 sps:$4 sm:$0xff]   ;;  %v1970_v15 = vld [vmem:[%s2677_s27 + $0x24] ss:$8 sps:$4 sm:$0xff]   ;;  %v1974_v17 = vld [vmem:[%s2677_s27 + $0x20] ss:$8 sps:$4 sm:$0xff]  }
  0xce   : > { %935 = vmatpush1.bf16.msra.mxu1 %v1963_v10  ;;  %895 = vmatprep.subr.bf16.mxu0 %v1964_v11  ;;  %v1969_v14 = vld [vmem:[%s2677_s27 + $0x110] ss:$8 sps:$4 sm:$0xff]   ;;  %v1972_v16 = vld [vmem:[%s2677_s27 + $0x124] ss:$8 sps:$4 sm:$0xff]   ;;  %v1975_v18 = vld [vmem:[%s2677_s27 + $0x120] ss:$8 sps:$4 sm:$0xff]  }
  0xcf   : > { %936 = vmatprep.subr.bf16.mxu1 %v1966_v12  ;;  %v1976_v19 = vld [vmem:[%s2677_s27 + $0x34] ss:$8 sps:$4 sm:$0xff]   ;;  %v1980_v21 = vld [vmem:[%s2677_s27 + $0x30] ss:$8 sps:$4 sm:$0xff]   ;;  %v1982_v23 = vld [vmem:[%s2677_s27 + $0x44] ss:$8 sps:$4 sm:$0xff]  }
  0xd0   : > { %v1978_v20 = vld [vmem:[%s2677_s27 + $0x134] ss:$8 sps:$4 sm:$0xff]   ;;  %v1981_v22 = vld [vmem:[%s2677_s27 + $0x130] ss:$8 sps:$4 sm:$0xff]   ;;  %v1984_v24 = vld [vmem:[%s2677_s27 + $0x144] ss:$8 sps:$4 sm:$0xff]  }
  0xd1   : > { %896 = vmatpush1.bf16.msra.mxu0 %v1968_v13  ;;  %v1986_v25 = vld [vmem:[%s2677_s27 + $0x40] ss:$8 sps:$4 sm:$0xff]   ;;  %v1988_v27 = vld [vmem:[%s2677_s27 + $0x54] ss:$8 sps:$4 sm:$0xff]   ;;  %v1992_v29 = vld [vmem:[%s2677_s27 + $0x50] ss:$8 sps:$4 sm:$0xff]  }
  0xd2   : > { %937 = vmatpush1.bf16.msra.mxu1 %v1969_v14  ;;  %897 = vmatprep.subr.bf16.mxu0 %v1970_v15  ;;  %v1987_v26 = vld [vmem:[%s2677_s27 + $0x140] ss:$8 sps:$4 sm:$0xff]   ;;  %v1990_v28 = vld [vmem:[%s2677_s27 + $0x154] ss:$8 sps:$4 sm:$0xff]   ;;  %v1993_v30 = vld [vmem:[%s2677_s27 + $0x150] ss:$8 sps:$4 sm:$0xff]  }
  0xd3   : > { %938 = vmatprep.subr.bf16.mxu1 %v1972_v16  ;;  %v1994_v31 = vld [vmem:[%s2677_s27 + $0x64] ss:$8 sps:$4 sm:$0xff]   ;;  %v1998_v33 = vld [vmem:[%s2677_s27 + $0x60] ss:$8 sps:$4 sm:$0xff]   ;;  %v2000_v35 = vld [vmem:[%s2677_s27 + $0x74] ss:$8 sps:$4 sm:$0xff]  }
  0xd4   : > { %v1996_v32 = vld [vmem:[%s2677_s27 + $0x164] ss:$8 sps:$4 sm:$0xff]   ;;  %v1999_v34 = vld [vmem:[%s2677_s27 + $0x160] ss:$8 sps:$4 sm:$0xff]   ;;  %v2002_v36 = vld [vmem:[%s2677_s27 + $0x174] ss:$8 sps:$4 sm:$0xff]  }
  0xd5   : > { %898 = vmatpush1.bf16.msra.mxu0 %v1974_v17  ;;  %v2004_v37 = vld [vmem:[%s2677_s27 + $0x70] ss:$8 sps:$4 sm:$0xff]   ;;  %v2006_v39 = vld [vmem:[%s2677_s27 + $0x84] ss:$8 sps:$4 sm:$0xff]   ;;  %v2010_v41 = vld [vmem:[%s2677_s27 + $0x80] ss:$8 sps:$4 sm:$0xff]  }
  0xd6   : > { %939 = vmatpush1.bf16.msra.mxu1 %v1975_v18  ;;  %899 = vmatprep.subr.bf16.mxu0 %v1976_v19  ;;  %v2005_v38 = vld [vmem:[%s2677_s27 + $0x170] ss:$8 sps:$4 sm:$0xff]   ;;  %v2008_v40 = vld [vmem:[%s2677_s27 + $0x184] ss:$8 sps:$4 sm:$0xff]   ;;  %v2011_v42 = vld [vmem:[%s2677_s27 + $0x180] ss:$8 sps:$4 sm:$0xff]  }
  0xd7   : > { %940 = vmatprep.subr.bf16.mxu1 %v1978_v20  ;;  %v2012_v43 = vld [vmem:[%s2677_s27 + $0x94] ss:$8 sps:$4 sm:$0xff]   ;;  %v2016_v45 = vld [vmem:[%s2677_s27 + $0x90] ss:$8 sps:$4 sm:$0xff]   ;;  %v2018_v47 = vld [vmem:[%s2677_s27 + $0xa4] ss:$8 sps:$4 sm:$0xff]  }
  0xd8   : > { %v2014_v44 = vld [vmem:[%s2677_s27 + $0x194] ss:$8 sps:$4 sm:$0xff]   ;;  %v2017_v46 = vld [vmem:[%s2677_s27 + $0x190] ss:$8 sps:$4 sm:$0xff]   ;;  %v2020_v48 = vld [vmem:[%s2677_s27 + $0x1a4] ss:$8 sps:$4 sm:$0xff]  }
  0xd9   : > { %900 = vmatpush1.bf16.msra.mxu0 %v1980_v21  ;;  %v2022_v49 = vld [vmem:[%s2677_s27 + $0xa0] ss:$8 sps:$4 sm:$0xff]   ;;  %v2024_v51 = vld [vmem:[%s2677_s27 + $0xb4] ss:$8 sps:$4 sm:$0xff]   ;;  %v2028_v56 = vld [vmem:[%s2677_s27 + $0xb0] ss:$8 sps:$4 sm:$0xff]  }
  0xda   : > { %941 = vmatpush1.bf16.msra.mxu1 %v1981_v22  ;;  %901 = vmatprep.subr.bf16.mxu0 %v1982_v23  ;;  %v2023_v50 = vld [vmem:[%s2677_s27 + $0x1a0] ss:$8 sps:$4 sm:$0xff]   ;;  %v2026_v52 = vld [vmem:[%s2677_s27 + $0x1b4] ss:$8 sps:$4 sm:$0xff]   ;;  %v2029_v57 = vld [vmem:[%s2677_s27 + $0x1b0] ss:$8 sps:$4 sm:$0xff]  }
  0xdb   : > { %942 = vmatprep.subr.bf16.mxu1 %v1984_v24  ;;  %v493_v53 = vld [vmem:[%s2670_s18] sm:$0xff]  ;;  %v494_v55 = vld [vmem:[%s2670_s18 + $0x8] sm:$0xff]  ;;  %p1684_p3 = scmp.ne.s32.totalorder %s2338_s12, 1 }
  0xdc   : > { %v1617_v54 = vcombine.high %v493_v53, %v493_v53  ;;  %v1619_v58 = vcombine.high %v494_v55, %v494_v55  ;;  %v2030_v59 = vld [vmem:[%s2677_s27 + $0xc4] ss:$8 sps:$4 sm:$0xff]   ;;  %v2034_v61 = vld [vmem:[%s2677_s27 + $0xc0] ss:$8 sps:$4 sm:$0xff]   ;;  %v2036_v63 = vld [vmem:[%s2677_s27 + $0xd4] ss:$8 sps:$4 sm:$0xff]   ;;  %v1616_v11 = vcombine.low %v493_v53, %v493_v53  ;;  %v1618_v12 = vcombine.low %v494_v55, %v494_v55 }
  0xdd   : > { %902 = vmatpush1.bf16.msra.mxu0 %v1986_v25  ;;  %v2032_v60 = vld [vmem:[%s2677_s27 + $0x1c4] ss:$8 sps:$4 sm:$0xff]   ;;  %v2035_v62 = vld [vmem:[%s2677_s27 + $0x1c0] ss:$8 sps:$4 sm:$0xff]   ;;  %v2038_v0 = vld [vmem:[%s2677_s27 + $0x1d4] ss:$8 sps:$4 sm:$0xff]  }
  0xde   : > { %943 = vmatpush1.bf16.msra.mxu1 %v1987_v26  ;;  %903 = vmatprep.subr.bf16.mxu0 %v1988_v27  ;;  %v2040_v1 = vld [vmem:[%s2677_s27 + $0xd0] ss:$8 sps:$4 sm:$0xff]   ;;  %v2042_v3 = vld [vmem:[%s2677_s27 + $0xe4] ss:$8 sps:$4 sm:$0xff]   ;;  %v2046_v5 = vld [vmem:[%s2677_s27 + $0xe0] ss:$8 sps:$4 sm:$0xff]  }
  0xdf   : > { %944 = vmatprep.subr.bf16.mxu1 %v1990_v28  ;;  %925 = vmatprep.mubr.bf16.mxu0 %v1617_v54  ;;  %v2041_v2 = vld [vmem:[%s2677_s27 + $0x1d0] ss:$8 sps:$4 sm:$0xff]   ;;  %v2044_v4 = vld [vmem:[%s2677_s27 + $0x1e4] ss:$8 sps:$4 sm:$0xff]   ;;  %v2047_v6 = vld [vmem:[%s2677_s27 + $0x1e0] ss:$8 sps:$4 sm:$0xff]  }
  0xe0   : > { %966 = vmatprep.mubr.bf16.mxu1 %v1619_v58  ;;  %v2048_v7 = vld [vmem:[%s2677_s27 + $0xf4] ss:$8 sps:$4 sm:$0xff]   ;;  %v2052_v9 = vld [vmem:[%s2677_s27 + $0xf0] ss:$8 sps:$4 sm:$0xff]   ;;  %v2058_v27 = vld [vmem:[#allocation8 + $0x40] sm:$0xff] (!%p1684_p3)   ;;  %s2849_s8 = sld [smem:[#allocation22_spill]] (!%p1684_p3) }
  0xe1   : > { %904 = vmatpush1.bf16.msra.mxu0 %v1992_v29  ;;  %v2050_v8 = vld [vmem:[%s2677_s27 + $0x1f4] ss:$8 sps:$4 sm:$0xff]   ;;  %v2053_v10 = vld [vmem:[%s2677_s27 + $0x1f0] ss:$8 sps:$4 sm:$0xff]   ;;  %v2059_v28 = vld [vmem:[#allocation8] sm:$0xff] (!%p1684_p3)   ;;  %vm2362_vm0 = vmmov (!%p1684_p3), 0  }
  0xe2   : > { %945 = vmatpush1.bf16.msra.mxu1 %v1993_v30  ;;  %905 = vmatprep.subr.bf16.mxu0 %v1994_v31  ;;  %v491_v14 = vld [vmem:[#allocation2] sm:$0xff]  ;;  %v492_v18 = vld [vmem:[#allocation2 + $0x8] sm:$0xff]  ;;  %v2060_v29 = vld [vmem:[#allocation8 + $0x48] sm:$0xff] (!%p1684_p3)   ;;  %s2850_s30 = sld [smem:[#allocation23_spill]] (!%p1684_p3)  ;;  %vm1356_vm1 = vcmask (!%p1684_p3), 64512  }
  0xe3   : > { %946 = vmatprep.subr.bf16.mxu1 %v1996_v32  ;;  %v2061_v30 = vld [vmem:[#allocation8 + $0x8] sm:$0xff] (!%p1684_p3)   ;;  %v2062_v31 = vld [vmem:[#allocation8 + $0x50] sm:$0xff] (!%p1684_p3)   ;;  %v1179_v58 = vld [vmem:[#allocation11 + $0x78] sm:$0xff] (!%p1684_p3) }
  0xe4   : > { %v2063_v32 = vld [vmem:[#allocation8 + $0x10] sm:$0xff] (!%p1684_p3)   ;;  %v1180_v55 = vld [vmem:[#allocation11 + $0x80] sm:$0xff] (!%p1684_p3) }
  0xe5   : > { %906 = vmatpush1.bf16.msra.mxu0 %v1998_v33  ;;  %v2064_v33 = vld [vmem:[#allocation8 + $0x58] sm:$0xff] (!%p1684_p3)   ;;  %v1177_v53 = vld [vmem:[#allocation11 + $0x68] sm:$0xff] (!%p1684_p3) }
  0xe6   : > { %947 = vmatpush1.bf16.msra.mxu1 %v1999_v34  ;;  %907 = vmatprep.subr.bf16.mxu0 %v2000_v35  ;;  %v2065_v34 = vld [vmem:[#allocation8 + $0x18] sm:$0xff] (!%p1684_p3)   ;;  %v2066_v35 = vld [vmem:[#allocation8 + $0x60] sm:$0xff] (!%p1684_p3)  }
  0xe7   : > { %948 = vmatprep.subr.bf16.mxu1 %v2002_v36  ;;  %v2067_v36 = vld [vmem:[#allocation8 + $0x20] sm:$0xff] (!%p1684_p3)  }
  0xe9   : > { %908 = vmatpush1.bf16.msra.mxu0 %v2004_v37  ;;  %v2068_v37 = vld [vmem:[#allocation8 + $0x68] sm:$0xff] (!%p1684_p3)  }
  0xea   : > { %949 = vmatpush1.bf16.msra.mxu1 %v2005_v38  ;;  %909 = vmatprep.subr.bf16.mxu0 %v2006_v39 }
  0xeb   : > { %950 = vmatprep.subr.bf16.mxu1 %v2008_v40  ;;  %v1165_v40 = vld [vmem:[#allocation11 + $0x8] sm:$0xff] (!%p1684_p3) }
  0xed   : > { %910 = vmatpush1.bf16.msra.mxu0 %v2010_v41  ;;  %v1168_v41 = vld [vmem:[#allocation11 + $0x20] sm:$0xff] (!%p1684_p3) }
  0xee   : > { %951 = vmatpush1.bf16.msra.mxu1 %v2011_v42  ;;  %911 = vmatprep.subr.bf16.mxu0 %v2012_v43  ;;  %v1164_v42 = vld [vmem:[#allocation11] sm:$0xff] (!%p1684_p3)  ;;  %v1167_v43 = vld [vmem:[#allocation11 + $0x18] sm:$0xff] (!%p1684_p3) }
  0xef   : > { %952 = vmatprep.subr.bf16.mxu1 %v2014_v44  ;;  %v2069_v44 = vld [vmem:[#allocation8 + $0x28] sm:$0xff] (!%p1684_p3)  }
  0xf1   : > { %912 = vmatpush1.bf16.msra.mxu0 %v2016_v45  ;;  %v1785_v45 = vpack.c.bf16 (!%p1684_p3), %v1168_v41, %v1165_v40  ;;  %v1190_v40 = vld [vmem:[#allocation11 + $0xd0] sm:$0xff] (!%p1684_p3)  ;;  %v1193_v41 = vld [vmem:[#allocation11 + $0xe8] sm:$0xff] (!%p1684_p3) }
  0xf2   : > { %953 = vmatpush1.bf16.msra.mxu1 %v2017_v46  ;;  %913 = vmatprep.subr.bf16.mxu0 %v2018_v47  ;;  %v1787_v46 = vpack.c.bf16 (!%p1684_p3), %v1167_v43, %v1164_v42  ;;  %v1171_v47 = vld [vmem:[#allocation11 + $0x38] sm:$0xff] (!%p1684_p3)  ;;  %v1830_v42 = vpack.c.bf16 (!%p1684_p3), %v1193_v41, %v1190_v40  ;;  %v1196_v43 = vld [vmem:[#allocation11 + $0x100] sm:$0xff] (!%p1684_p3) }
  0xf3   : > { %954 = vmatprep.subr.bf16.mxu1 %v2020_v48  ;;  %v1174_v48 = vld [vmem:[#allocation11 + $0x50] sm:$0xff] (!%p1684_p3) }
  0xf5   : > { %914 = vmatpush1.bf16.msra.mxu0 %v2022_v49  ;;  %v1170_v49 = vld [vmem:[#allocation11 + $0x30] sm:$0xff] (!%p1684_p3) }
  0xf6   : > { %955 = vmatpush1.bf16.msra.mxu1 %v2023_v50  ;;  %915 = vmatprep.subr.bf16.mxu0 %v2024_v51  ;;  %v1173_v50 = vld [vmem:[#allocation11 + $0x48] sm:$0xff] (!%p1684_p3) }
  0xf7   : > { %956 = vmatprep.subr.bf16.mxu1 %v2026_v52  ;;  %v2070_v51 = vld [vmem:[#allocation8 + $0x70] sm:$0xff] (!%p1684_p3)   ;;  %v1789_v52 = vpack.c.bf16 (!%p1684_p3), %v1174_v48, %v1171_v47  ;;  %v1791_v54 = vpack.c.bf16 (!%p1684_p3), %v1173_v50, %v1170_v49  ;;  %v1207_v49 = vld [vmem:[#allocation11 + $0x158] sm:$0xff] (!%p1684_p3) }
  0xf8   : > { %v1205_v47 = vld [vmem:[#allocation11 + $0x148] sm:$0xff] (!%p1684_p3)  ;;  %v1210_v50 = vld [vmem:[#allocation11 + $0x170] sm:$0xff] (!%p1684_p3) }
  0xf9   : > { %916 = vmatpush1.bf16.msra.mxu0 %v2028_v56  ;;  %v1793_v56 = vpack.c.bf16 (!%p1684_p3), %v1180_v55, %v1177_v53  ;;  %v1209_v53 = vld [vmem:[#allocation11 + $0x168] sm:$0xff] (!%p1684_p3)  ;;  %v1208_v55 = vld [vmem:[#allocation11 + $0x160] sm:$0xff] (!%p1684_p3) }
  0xfa   : > { %957 = vmatpush1.bf16.msra.mxu1 %v2029_v57  ;;  %917 = vmatprep.subr.bf16.mxu0 %v2030_v59  ;;  %v1176_v57 = vld [vmem:[#allocation11 + $0x60] sm:$0xff] (!%p1684_p3)  ;;  %v2071_v59 = vld [vmem:[#allocation8 + $0x30] sm:$0xff] (!%p1684_p3)  }
  0xfb   : > { %958 = vmatprep.subr.bf16.mxu1 %v2032_v60  ;;  %v1183_v60 = vld [vmem:[#allocation11 + $0x98] sm:$0xff] (!%p1684_p3) }
  0xfd   : > { %918 = vmatpush1.bf16.msra.mxu0 %v2034_v61  ;;  %v1186_v61 = vld [vmem:[#allocation11 + $0xb0] sm:$0xff] (!%p1684_p3) }
  0xfe   : > { %959 = vmatpush1.bf16.msra.mxu1 %v2035_v62  ;;  %919 = vmatprep.subr.bf16.mxu0 %v2036_v63  ;;  %v2072_v62 = vld [vmem:[#allocation8 + $0x78] sm:$0xff] (!%p1684_p3)   ;;  %v1795_v63 = vpack.c.bf16 (!%p1684_p3), %v1179_v58, %v1176_v57 }
  0xff   : > { %960 = vmatprep.subr.bf16.mxu1 %v2038_v0  ;;  %v1797_v0 = vpack.c.bf16 (!%p1684_p3), %v1186_v61, %v1183_v60  ;;  %v1355_v58 = vld [vmem:[%s2849_s8 + $0x8] sm:$0xff] (!%p1684_p3)  ;;  %v1685_v61 = vld [vmem:[#allocation9] ss:$0 sm:$0xff] (!%p1684_p3) }
 0x101   : > { %920 = vmatpush1.bf16.msra.mxu0 %v2040_v1  ;;  %v1182_v1 = vld [vmem:[#allocation11 + $0x90] sm:$0xff] (!%p1684_p3) }
 0x102   : > { %961 = vmatpush1.bf16.msra.mxu1 %v2041_v2  ;;  %921 = vmatprep.subr.bf16.mxu0 %v2042_v3  ;;  %v1185_v2 = vld [vmem:[#allocation11 + $0xa8] sm:$0xff] (!%p1684_p3) }
 0x103   : > { %962 = vmatprep.subr.bf16.mxu1 %v2044_v4  ;;  %v2073_v4 = vld [vmem:[#allocation8 + $0x38] sm:$0xff] (!%p1684_p3)  }
 0x105   : > { %922 = vmatpush1.bf16.msra.mxu0 %v2046_v5  ;;  %v1189_v5 = vld [vmem:[#allocation11 + $0xc8] sm:$0xff] (!%p1684_p3) }
 0x106   : > { %963 = vmatpush1.bf16.msra.mxu1 %v2047_v6  ;;  %923 = vmatprep.subr.bf16.mxu0 %v2048_v7  ;;  %v1192_v6 = vld [vmem:[#allocation11 + $0xe0] sm:$0xff] (!%p1684_p3) }
 0x107   : > { %964 = vmatprep.subr.bf16.mxu1 %v2050_v8 }
 0x109   : > { %924 = vmatpush1.bf16.msra.mxu0 %v2052_v9  ;;  %v1166_v9 = vld [vmem:[#allocation11 + $0x10] sm:$0xff] (!%p1684_p3) }
 0x10a   : > { %965 = vmatpush1.bf16.msra.mxu1 %v2053_v10  ;;  %1711 = vmatprep.subr.bf16.mxu0 (!%p1684_p3), %v2058_v27  ;;  %v1169_v10 = vld [vmem:[#allocation11 + $0x28] sm:$0xff] (!%p1684_p3) }
 0x10b   : > { %1786 = vmatprep.subr.bf16.mxu1 (!%p1684_p3), %v1785_v45  ;;  %v1201_v27 = vld [vmem:[#allocation11 + $0x128] sm:$0xff] (!%p1684_p3) }
 0x10c   : > { %926 = vmatmul.mubr.bf16.vlgmr.msra.gmra.mrb[0].mxu0 %v1616_v11  ;;  %v1799_v11 = vpack.c.bf16 (!%p1684_p3), %v1185_v2, %v1182_v1 }
 0x10d   : > { %967 = vmatmul.mubr.bf16.vlgmr.msra.gmra.mrb[0].mxu1 %v1618_v12  ;;  %1712 = vmatpush3.bf16.msra.mxu0 (!%p1684_p3), %v2059_v28  ;;  %v1204_v28 = vld [vmem:[#allocation11 + $0x140] sm:$0xff] (!%p1684_p3) }
 0x10e   : > { %1713 = vmatprep.subr.bf16.mxu0 (!%p1684_p3), %v2060_v29  ;;  %1788 = vmatpush1.bf16.msra.mxu1 (!%p1684_p3), %v1787_v46  ;;  %v1178_v29 = vld [vmem:[#allocation11 + $0x70] sm:$0xff] (!%p1684_p3) }
 0x10f   : > { %1790 = vmatprep.subr.bf16.mxu1 (!%p1684_p3), %v1789_v52  ;;  %v1202_v46 = vld [vmem:[#allocation11 + $0x130] sm:$0xff] (!%p1684_p3) }
 0x110   : > { %v1836_v48 = vpack.c.bf16 (!%p1684_p3), %v1205_v47, %v1202_v46  ;;  %v1206_v52 = vld [vmem:[#allocation11 + $0x150] sm:$0xff] (!%p1684_p3) }
 0x111   : > { %1714 = vmatpush3.bf16.msra.mxu0 (!%p1684_p3), %v2061_v30  ;;  %v1181_v30 = vld [vmem:[#allocation11 + $0x88] sm:$0xff] (!%p1684_p3) }
 0x112   : > { %1715 = vmatprep.subr.bf16.mxu0 (!%p1684_p3), %v2062_v31  ;;  %1792 = vmatpush1.bf16.msra.mxu1 (!%p1684_p3), %v1791_v54  ;;  %v1815_v54 = vpack.c.bf16 (!%p1684_p3), %v1209_v53, %v1206_v52 }
 0x113   : > { %1794 = vmatprep.subr.bf16.mxu1 (!%p1684_p3), %v1793_v56  ;;  %v1211_v56 = vld [vmem:[#allocation11 + $0x178] sm:$0xff] (!%p1684_p3) }
 0x114   : > { %v1839_v57 = vpack.c.bf16 (!%p1684_p3), %v1211_v56, %v1208_v55 }
 0x115   : > { %1716 = vmatpush3.bf16.msra.mxu0 (!%p1684_p3), %v2063_v32  ;;  %v1809_v32 = vpack.c.bf16 (!%p1684_p3), %v1204_v28, %v1201_v27 }
 0x116   : > { %1717 = vmatprep.subr.bf16.mxu0 (!%p1684_p3), %v2064_v33  ;;  %1796 = vmatpush1.bf16.msra.mxu1 (!%p1684_p3), %v1795_v63  ;;  %v1200_v33 = vld [vmem:[#allocation11 + $0x120] sm:$0xff] (!%p1684_p3) }
 0x117   : > { %1798 = vmatprep.subr.bf16.mxu1 (!%p1684_p3), %v1797_v0 }
 0x119   : > { %1718 = vmatpush3.bf16.msra.mxu0 (!%p1684_p3), %v2065_v34  ;;  %v1203_v34 = vld [vmem:[#allocation11 + $0x138] sm:$0xff] (!%p1684_p3) }
 0x11a   : > { %1719 = vmatprep.subr.bf16.mxu0 (!%p1684_p3), %v2066_v35  ;;  %1800 = vmatpush1.bf16.msra.mxu1 (!%p1684_p3), %v1799_v11  ;;  %v1824_v35 = vpack.c.bf16 (!%p1684_p3), %v1181_v30, %v1178_v29 }
 0x11d   : > { %1720 = vmatpush3.bf16.msra.mxu0 (!%p1684_p3), %v2067_v36  ;;  %v1184_v36 = vld [vmem:[#allocation11 + $0xa0] sm:$0xff] (!%p1684_p3) }
 0x11e   : > { %1721 = vmatprep.subr.bf16.mxu0 (!%p1684_p3), %v2068_v37  ;;  %v1187_v37 = vld [vmem:[#allocation11 + $0xb8] sm:$0xff] (!%p1684_p3) }
 0x121   : > { %1722 = vmatpush3.bf16.msra.mxu0 (!%p1684_p3), %v2069_v44  ;;  %v1199_v44 = vld [vmem:[#allocation11 + $0x118] sm:$0xff] (!%p1684_p3) }
 0x122   : > { %1723 = vmatprep.subr.bf16.mxu0 (!%p1684_p3), %v2070_v51  ;;  %v1833_v45 = vpack.c.bf16 (!%p1684_p3), %v1199_v44, %v1196_v43  ;;  %v1813_v51 = vpack.c.bf16 (!%p1684_p3), %v1210_v50, %v1207_v49 }
 0x125   : > { %1724 = vmatpush3.bf16.msra.mxu0 (!%p1684_p3), %v2071_v59  ;;  %v2361_v59 = vmov (!%p1684_p3), 0.0  }
 0x126   : > { %1725 = vmatprep.subr.bf16.mxu0 (!%p1684_p3), %v2072_v62  ;;  %1276 = vmatprep.mubr.f32.mxu1 (!%p1684_p3), %v2361_v59 }
 0x129   : > { %1726 = vmatpush3.bf16.msra.mxu0 (!%p1684_p3), %v2073_v4  ;;  %v1353_v4 = vld [vmem:[%s2850_s30] sm:$0xff] (!%p1684_p3) }
 0x1df   : > { %v927_v13 = vpop.f32.mrb[0].mxu0 }
 0x1e0   : > { %v968_v15 = vpop.f32.mrb[0].mxu1  ;;  %v929_v17 = vpop.f32.mrb[1].mxu0  ;;  %982 = sbr.rel (%p1684_p3) target bundleno = 949 (0x3b5), region = 88 }
 0x1e1   : > { %v969_v16 = vadd.f32 %v968_v15, %v927_v13  ;;  %v970_v19 = vpop.f32.mrb[1].mxu1  ;;  %v931_v21 = vpop.f32.mrb[2].mxu0  ;;  %v1801_v13 = vpack.c.bf16 (!%p1684_p3), %v1192_v6, %v1189_v5  ;;  %v1191_v15 = vld [vmem:[#allocation11 + $0xd8] sm:$0xff] (!%p1684_p3) }
 0x1e2   : > { %v971_v20 = vadd.f32 %v970_v19, %v929_v17  ;;  %v972_v22 = vpop.f32.mrb[2].mxu1  ;;  %v932_v24 = vpop.f32.mrb[3].mxu0  ;;  %v1195_v17 = vld [vmem:[#allocation11 + $0xf8] sm:$0xff] (!%p1684_p3)  ;;  %v2360_v19 = vmov (!%p1684_p3), 0.0|0.0  }
 0x1e3   : > { %v975_v23 = vadd.f32 %v969_v16, %v491_v14  ;;  %v973_v25 = vpop.f32.mrb[3].mxu1  ;;  %v1188_v14 = vld [vmem:[#allocation11 + $0xc0] sm:$0xff] (!%p1684_p3)  ;;  %v1818_v16 = vpack.c.bf16 (!%p1684_p3), %v1169_v10, %v1166_v9  ;;  %1817 = vmatprep.subr.bf16.mxu0 (!%p1684_p3), %v2360_v19  ;;  %v1175_v21 = vld [vmem:[#allocation11 + $0x58] sm:$0xff] (!%p1684_p3)  ;;  %1802 = vmatprep.subr.bf16.mxu1 (!%p1684_p3), %v1801_v13  ;;  %v1194_v24 = vld [vmem:[#allocation11 + $0xf0] sm:$0xff] (!%p1684_p3) }
 0x1e4   : > { %v976_v26 = vadd.f32 %v971_v20, %v492_v18  ;;  %v1198_v18 = vld [vmem:[#allocation11 + $0x110] sm:$0xff] (!%p1684_p3)  ;;  %v1172_v20 = vld [vmem:[#allocation11 + $0x40] sm:$0xff] (!%p1684_p3)  ;;  %v1803_v22 = vpack.c.bf16 (!%p1684_p3), %v1191_v15, %v1188_v14  ;;  %v1197_v25 = vld [vmem:[#allocation11 + $0x108] sm:$0xff] (!%p1684_p3) }
 0x1e5   : > { %977 = vst [vmem:[#allocation2] sm:$0xff] %v975_v23  ;;  %v1805_v23 = vpack.c.bf16 (!%p1684_p3), %v1198_v18, %v1195_v17  ;;  %v1807_v31 = vpack.c.bf16 (!%p1684_p3), %v1197_v25, %v1194_v24 }
 0x1e6   : > { %978 = vst [vmem:[#allocation2 + $0x8] sm:$0xff] %v976_v26  ;;  %v1821_v26 = vpack.c.bf16 (!%p1684_p3), %v1175_v21, %v1172_v20  ;;  %1804 = vmatpush1.bf16.msra.mxu1 (!%p1684_p3), %v1803_v22 }
 0x1e7   : > { %1806 = vmatprep.subr.bf16.mxu1 %v1805_v23 }
 0x1ea   : > { %1808 = vmatpush1.bf16.msra.mxu1 %v1807_v31 }
 0x1eb   : > { %1810 = vmatprep.subr.bf16.mxu1 %v1809_v32 }
 0x1ec   : > { %v983_v39 = vld [vmem:[#allocation2] sm:$0xff] }
 0x1ed   : > { %v984_v38 = vld [vmem:[#allocation2 + $0x8] sm:$0xff] }
 0x1ee   : > { %2074 = vtanh.f32 %v984_v38  ;;  %v1811_v38 = vpack.c.bf16 %v1203_v34, %v1200_v33 }
 0x1ef   : > { %2076 = vtanh.f32 %v983_v39  ;;  %v1827_v39 = vpack.c.bf16 %v1187_v37, %v1184_v36 }
 0x1f0   : > { %1812 = vmatpush1.bf16.msra.mxu1 %v1811_v38 }
 0x1f1   : > { %1814 = vmatprep.subr.bf16.mxu1 %v1813_v51 }
 0x1f4   : > { %1816 = vmatpush1.bf16.msra.mxu1 %v1815_v54 }
 0x1f5   : > { %1360 = vmatprep.subr.mxu1 %v1355_v58 }
 0x1f8   : > { %v2075_v3 = vpop.eup %2074 }
 0x1f9   : > { %v2077_v7 = vpop.eup %2076  ;;  %v988_v8 = vpack.c.bf16 %v2075_v3, %v2075_v3  ;;  %v1354_v3 = vld [vmem:[%s2849_s8] sm:$0xff] }
 0x1fa   : > { %v987_v12 = vpack.c.bf16 %v2077_v7, %v2077_v7 }
 0x1fb   : > { %1156 = vmatprep.mubr.bf16.mxu0 %v988_v8 }
 0x1fc   : > { %1157 = vmatmul.mubr.bf16.vlgmr.msra.gmra.mrb[0].mxu0 %v987_v12  ;;  %v1703_v12 = vld [vmem:[#allocation12] ss:$0 sm:$0xff] }
 0x1fd   : > { %1819 = vmatpush3.bf16.msra.mxu0 %v1818_v16  ;;  %1782 = vmatprep.mubr.msk.f32.mxu0 %vm2362_vm0, %v2361_v59 }
 0x1fe   : > { %1820 = vmatprep.subr.bf16.mxu0 %v2360_v19 }
 0x201   : > { %1822 = vmatpush3.bf16.msra.mxu0 %v1821_v26 }
 0x202   : > { %1823 = vmatprep.subr.bf16.mxu0 %v2360_v19 }
 0x205   : > { %1825 = vmatpush3.bf16.msra.mxu0 %v1824_v35 }
 0x206   : > { %1826 = vmatprep.subr.bf16.mxu0 %v2360_v19 }
 0x209   : > { %1828 = vmatpush3.bf16.msra.mxu0 %v1827_v39 }
 0x20a   : > { %1829 = vmatprep.subr.bf16.mxu0 %v2360_v19 }
 0x20d   : > { %1831 = vmatpush3.bf16.msra.mxu0 %v1830_v42 }
 0x20e   : > { %1832 = vmatprep.subr.bf16.mxu0 %v2360_v19 }
 0x211   : > { %1834 = vmatpush3.bf16.msra.mxu0 %v1833_v45 }
 0x212   : > { %1835 = vmatprep.subr.bf16.mxu0 %v2360_v19 }
 0x215   : > { %1837 = vmatpush3.bf16.msra.mxu0 %v1836_v48 }
 0x216   : > { %1838 = vmatprep.subr.bf16.mxu0 %v2360_v19 }
 0x219   : > { %1840 = vmatpush3.bf16.msra.mxu0 %v1839_v57 }
 0x2cf   : > { %v1727_v60 = vpop.f32.mrb[0].mxu0 }
 0x2d0   : > { %v1728_v62 = vpop.f32.mrb[1].mxu0 }
 0x2d1   : > { %v1729_v63 = vadd.f32 %v1728_v62, %v1727_v60  ;;  %v1730_v0 = vpop.f32.mrb[2].mxu0 }
 0x2d2   : > { %v1731_v1 = vpop.f32.mrb[3].mxu0 }
 0x2d3   : > { %v1159_v2 = vadd.f32 %v1729_v63, %v1685_v61 }
 0x2d5   : > { %1277 = vmatmul.mubr.f32.vlgmr.msra.gmra.mrb[0].mxu1 %v1159_v2  ;;  %1783 = vmatmul.mubr.f32.vlgmr.msra.gmra.mrb[4].mxu0 %v1159_v2 }
 0x2d6   : > { %1361 = vmatpush1.msra.mxu1 %v1354_v3  ;;  %1424 = vmatprep.mubr.f32.mxu1 %v2361_v59 }
 0x2d9   : > { %1702 = vmatmul.mubr.msk.f32.vlgmr.msra.gmra.mrb[2].mxu1 %vm1356_vm1, %v1353_v4 }
 0x3a8   : > { %v1278_v5 = vpop.f32.mrb[0].mxu1  ;;  %v1349_v6 = vpop.f32.mrb[4].mxu0 }
 0x3a9   : > { %v1280_v7 = vpop.f32.mrb[1].mxu1  ;;  %v1784_v8 = vpop.f32.mrb[5].mxu0 }
 0x3ac   : > { %v1426_v9 = vpop.f32.mrb[2].mxu1 }
 0x3ad   : > { %v1440_v10 = vsub.f32 %v1278_v5, %v1426_v9  ;;  %v1428_v11 = vpop.f32.mrb[3].mxu1 }
 0x3ae   : > { %v1431_v13 = vadd.f32 %v1428_v11, %v1349_v6 }
 0x3af   : > { %v1441_v14 = vmul.f32 %v1440_v10, %v1280_v7 }
 0x3b0   : > { %v1439_v15 = vadd.f32 %v1703_v12, %v1431_v13 }
 0x3b2   : > { %v1442_v16 = vadd.f32 %v1441_v14, %v1439_v15 }
 0x3b4   : > { %1443 = vst [vmem:[#allocation14] sm:$0xff] %v1442_v16 }
 0x3b5 PF: > { %p1894_p10 = scmp.eq.s32.totalorder %s2445_s15, 1  ;;  %s2363_s25 = smov [#allocation14]  }
 0x3b6   : > { %s1453_s20 = sshll.u32 %s2363_s25, 4  ;;  %s1454_s20 = int_to_ptr.vmem [resolvable:$true] %s1453_s20 }
 0x3b7   : > { %s2250_s23 = scalar_lea.vmem %s1454_s20, 128  ;;  %p2257_p2 = scmp.lt.s32.totalorder %s1454_s20, %s1454_s20 }
 0x3b8   : > { %p2251_p11 = scmp.ne.s32.totalorder %s1454_s20, %s2250_s23  ;;  %p2258_p8 = scmp.lt.s32.totalorder %s2250_s23, %s2250_s23 }
 0x3ba   : > { %p2252_p13 = pnand %p2251_p11, %p1894_p10  ;;  %p2259_p4 = por %p2258_p8, %p2257_p2 }
 0x3bc   : > { %p2253_p5 = pneg %p2252_p13 }
 0x3be   : > { %p2260_p12 = pnand %p2259_p4, %p2253_p5 }
 0x3c0   : > { %2263 = shalt.err (!%p2260_p12)
}
 0x3c1   : > { %s2851_s21 = sld [smem:[#allocation24_spill]] }
 0x3c7   : > { %s2264_s19 = scalar_lea.hbm %s2851_s21, 128 }
 0x3c8   : > { %p2265_p6 = scmp.ne.s32.totalorder %s2851_s21, %s2264_s19  ;;  %p2270_p1 = scmp.lt.u32.totalorder %s2264_s19, %s2851_s21 }
 0x3ca   : > { %p2266_p9 = pnand %p2265_p6, %p1894_p10 }
 0x3cc   : > { %p2267_p7 = pneg %p2266_p9 }
 0x3ce   : > { %p2272_p0 = pnand %p2270_p1, %p2267_p7 }
 0x3d0   : > { %2275 = shalt.err (!%p2272_p0)
}
 0x3d1   : > { %1862 = dma.vmem_to_hbm [thread:$0]  (%p1894_p10), %s1454_s20, 128, %s2851_s21, [#allocation5]  }
 0x3d2   : > { %2321 = dma.done.wait (%p1894_p10), [#allocation5], 128  }
 0x3d3   : > { %2323 = vsyncadd (%p1894_p10), [#allocation5], 4294967168 }
 0x3d4 PF: > { %s28_s14 = sadd.s32 1, %s2346_s14   ;;  %s2852_s30 = smov %s2330_s10 }
 0x3d5   : > { %p25_p3 = scmp.ge.s32.totalorder %s28_s14, 4   ;;  %s2853_s10 = smov %s2334_s11 }
 0x3d6   : > { %s2854_s11 = smov %s2585_s26  ;;  %s2855_s12 = smov %s2342_s13 }
 0x3d7   : > { %s2856_s13 = smov %s2858_s29  ;;  %27 = sbr.rel (!%p25_p3) target bundleno = 14 (0xe), region = 134 }
 0x3de   :  { %1466 = vsyncpa [#allocation4], 1 }
 0x3df   :  { %1468 = vsyncpa [#allocation4 + $0x1], 1 }
 0x3e0   :  { %1469 = vsyncpa [#allocation7], 1 }
 0x3e1   :  { %1471 = vsyncpa [#allocation7 + $0x1], 1 }
 0x3e2   :  { %1472 = vsyncpa [#allocation10], 1 }
 0x3e3   :  { %1473 = vsyncpa [#allocation13], 1 }
 0x3e4   :  { %1474 = vsyncpa [#allocation5], 1 }
 0x3e5   :  { %1476 = vsyncpa [#allocation5 + $0x1], 1 }

</bundles_post_ra>
